<compile_context>
chip_gen: v7x
topology: tpu7x:2x2x1
jax: 0.10.0
libtpu: 0.0.40
codegen_flags: <defaults>
</compile_context>

<pallas_src>
import functools
import math

import jax
import jax.numpy as jnp
from jax.experimental import pallas as pl
from jax.experimental.pallas import tpu as pltpu

_LANE = 128


def _round_up(x, m):
    return ((x + m - 1) // m) * m


def _vmem_capacity_bytes():
    """Per-core VMEM capacity; conservative (v7x = 64 MiB) if the query fails."""
    try:
        return int(pltpu.get_tpu_info().vmem_capacity_bytes)
    except Exception:
        return 64 * 2**20


def _vmem_estimate(tm, tk, d_pad, o_pad, g, out_bytes):
    """Double-buffered VMEM working-set estimate for one layer kernel."""
    adj = 2 * tm * tk * 2            # adjacency tile (bf16)
    xk = 2 * tk * d_pad * 2          # x K-chunk (bf16)
    xt = 2 * tm * d_pad * 2          # x row tile for the alpha-skip term (bf16)
    wstk = 2 * g * d_pad * o_pad * 2  # resident weight stack (bf16)
    wsum = 2 * d_pad * o_pad * 2     # resident summed weight (bf16)
    out = 2 * tm * o_pad * out_bytes  # output tile
    scr = tm * d_pad * 4 + tm * o_pad * 4   # f32 scratch accumulators
    return adj + xk + xt + wstk + wsum + out + scr


def _choose_tiles(n_pad, d_pad, o_pad, g, out_bytes, budget):
    """Pick (row tile tm, contraction tile tk) that divide n_pad and fit budget."""
    # Prefer >= 2 row tiles so the "parallel" axis can split across TensorCores.
    tm_cands = [t for t in (256, 128, 64) if n_pad % t == 0 and n_pad // t >= 2]
    if not tm_cands:
        tm_cands = [n_pad]
    if n_pad <= 1024:
        tk_cands = [n_pad]
    else:
        tk_cands = [t for t in (1024, 512, 256, 128) if n_pad % t == 0]
        if not tk_cands:
            tk_cands = [n_pad]
    for tm in tm_cands:
        for tk in tk_cands:
            if _vmem_estimate(tm, tk, d_pad, o_pad, g, out_bytes) <= budget:
                return tm, tk
    return tm_cands[-1], tk_cands[-1]


def _lgen_layer_kernel(adj_ref, xk_ref, xtile_ref, w_ref, wsum_ref, out_ref,
                       t_acc, o_acc, *, alpha, num_graphs, apply_relu):
    """One LGEN layer step on grid (row tile i, graph j, contraction chunk k)."""
    j = pl.program_id(1)
    k = pl.program_id(2)
    nk = pl.num_programs(2)

    @pl.when(jnp.logical_and(j == 0, k == 0))
    def _():
        o_acc[...] = jnp.zeros_like(o_acc)

    @pl.when(k == 0)
    def _():
        t_acc[...] = jnp.zeros_like(t_acc)

    # T[tile] += A_j[tile, kchunk] @ x[kchunk, :]   (bf16 MXU, f32 accumulation)
    t_acc[...] += jnp.dot(adj_ref[...], xk_ref[...],
                          preferred_element_type=jnp.float32)

    @pl.when(k == nk - 1)
    def _():
        # O[tile] += (A_j x)[tile] @ W_j  — W stack is resident, dynamic index j.
        o_acc[...] += jnp.dot(t_acc[...].astype(jnp.bfloat16), w_ref[j],
                              preferred_element_type=jnp.float32)

    @pl.when(jnp.logical_and(j == num_graphs - 1, k == nk - 1))
    def _():
        # alpha-skip term added once: a/G * x[tile] @ (sum_j W_j)
        skip = jnp.dot(xtile_ref[...], wsum_ref[...],
                       preferred_element_type=jnp.float32)
        out = ((1.0 - alpha) / num_graphs) * o_acc[...] \
            + (alpha / num_graphs) * skip
        if apply_relu:
            out = jnp.maximum(out, 0.0)
        out_ref[...] = out.astype(out_ref.dtype)


def lgen_layer(adj_p, h, w_p, wsum_p, *, alpha, apply_relu, out_dtype):
    """adj_p: (G, Np, Np) bf16, h: (Np, Dp) bf16, w_p: (G, Dp, Op) bf16,
    wsum_p: (Dp, Op) bf16  ->  (Np, Op) out_dtype."""
    g, n_pad, _ = adj_p.shape
    d_pad = h.shape[1]
    o_pad = w_p.shape[2]
    out_bytes = jnp.dtype(out_dtype).itemsize

    capacity = _vmem_capacity_bytes()
    budget = capacity - 16 * 2**20                 # headroom for compiler scratch
    tm, tk = _choose_tiles(n_pad, d_pad, o_pad, g, out_bytes, budget)
    assert n_pad % tm == 0 and n_pad % tk == 0

    est = _vmem_estimate(tm, tk, d_pad, o_pad, g, out_bytes)
    # Always set the scoped VMEM limit (v5e default is only 16 MiB), capped with
    # headroom below the physical per-core capacity (64 MiB on v7x).
    vmem_limit = int(min(capacity - 8 * 2**20, max(int(est * 1.4), 24 * 2**20)))

    kernel = functools.partial(_lgen_layer_kernel, alpha=alpha,
                               num_graphs=g, apply_relu=apply_relu)

    return pl.pallas_call(
        kernel,
        out_shape=jax.ShapeDtypeStruct((n_pad, o_pad), out_dtype),
        grid_spec=pltpu.PrefetchScalarGridSpec(
            num_scalar_prefetch=0,
            grid=(n_pad // tm, g, n_pad // tk),        # reductions (j, k) last
            in_specs=[
                # A_j[row tile, K chunk]
                pl.BlockSpec((None, tm, tk), lambda i, j, k: (j, i, k)),
                # x K-chunk (second matmul operand of the adjacency product)
                pl.BlockSpec((tk, d_pad), lambda i, j, k: (k, 0)),
                # x row tile (alpha-skip term) — fetched once per row tile
                pl.BlockSpec((tm, d_pad), lambda i, j, k: (i, 0)),
                # full per-layer weight stack, resident for the whole call
                pl.BlockSpec((g, d_pad, o_pad), lambda i, j, k: (0, 0, 0)),
                # sum_j W_j, resident
                pl.BlockSpec((d_pad, o_pad), lambda i, j, k: (0, 0)),
            ],
            out_specs=pl.BlockSpec((tm, o_pad), lambda i, j, k: (i, 0)),
            scratch_shapes=[
                pltpu.VMEM((tm, d_pad), jnp.float32),   # T = A_j x accumulator
                pltpu.VMEM((tm, o_pad), jnp.float32),   # layer output accumulator
            ],
        ),
        compiler_params=pltpu.CompilerParams(
            dimension_semantics=("parallel", "arbitrary", "arbitrary"),
            vmem_limit_bytes=vmem_limit),
    )(adj_p, h, h, w_p, wsum_p)


class LGEN:
    """JAX/Pallas port of the PyTorch LGEN module (use_bn=False, eval mode)."""

    def __init__(self, input_dim, hidden, classes, dropout, num_graphs,
                 num_layers, alpha, activation, use_bn, key):
        assert not use_bn, "use_bn=False configuration implemented"
        self.dropout = dropout          # TODO(synk): identity in eval mode
        self.num_graphs = num_graphs
        self.num_layers = num_layers
        self.alpha = float(alpha)
        self.activation = activation
        self.use_bn = use_bn
        self.input_dim = input_dim
        self.classes = classes

        # Deterministic weight init, matching GraphConvolution.init_parameter:
        # uniform(-stdv, stdv) with stdv = 1/sqrt(out_dim).
        self.weights = []    # f32 unpadded stacks (reference / source of truth)
        self.w_pad = []      # bf16, zero-padded lane-dense (G, Dp, Op)
        self.wsum_pad = []   # bf16, (Dp, Op): sum over graphs (alpha-skip term)
        for i in range(num_layers):
            if i == 0:
                in_dim, out_dim = input_dim, hidden
            elif i < num_layers - 1:
                in_dim, out_dim = hidden, hidden
            else:
                in_dim, out_dim = hidden, classes
            stdv = 1.0 / math.sqrt(out_dim)
            key, sub = jax.random.split(key)
            w = jax.random.uniform(sub, (num_graphs, in_dim, out_dim),
                                   jnp.float32, minval=-stdv, maxval=stdv)
            self.weights.append(w)

            d_pad = _round_up(in_dim, _LANE)
            o_pad = _round_up(out_dim, _LANE)
            w_p = jnp.pad(w, ((0, 0), (0, d_pad - in_dim), (0, o_pad - out_dim)))
            self.w_pad.append(w_p.astype(jnp.bfloat16))
            self.wsum_pad.append(jnp.sum(w_p, axis=0).astype(jnp.bfloat16))

    def __call__(self, adj_stack, x):
        # TODO(synk): dropout / BatchNorm1d are identity here (eval, use_bn=False).
        g, n, _ = adj_stack.shape
        n_pad = _round_up(n, _LANE)                 # 128-multiple, never 512
        in_pad = _round_up(self.input_dim, _LANE)

        # Pad once (zero rows/cols contribute nothing) and cast to bf16 for the
        # HBM-bound adjacency stream and the MXU inputs.
        adj_p = jnp.pad(adj_stack,
                        ((0, 0), (0, n_pad - n), (0, n_pad - n))).astype(jnp.bfloat16)
        h = jnp.pad(x, ((0, n_pad - n),
                        (0, in_pad - x.shape[1]))).astype(jnp.bfloat16)

        out = None
        for i in range(self.num_layers):
            last = (i == self.num_layers - 1)
            apply_relu = bool(self.activation) and not last
            out = lgen_layer(adj_p, h, self.w_pad[i], self.wsum_pad[i],
                             alpha=self.alpha, apply_relu=apply_relu,
                             out_dtype=jnp.float32 if last else jnp.bfloat16)
            if not last:
                h = out                  # already bf16, emitted by the kernel
        return out[:n, :self.classes]

    def reference(self, adj_stack, x):
        """Pure-JAX f32 reference of the same forward pass (for validation)."""
        h = x
        for i in range(self.num_layers):
            outs = []
            for j in range(self.num_graphs):
                hh = (1.0 - self.alpha) * adj_stack[j] @ h + self.alpha * h
                outs.append(hh @ self.weights[i][j])
            h = sum(outs) / self.num_graphs
            if i < self.num_layers - 1 and self.activation:
                h = jnp.maximum(h, 0.0)
        return h


if __name__ == "__main__":
    key = jax.random.PRNGKey(0)

    # Small, module-consistent shapes.
    N = 16            # nodes
    INPUT_DIM = 32
    HIDDEN = 32
    CLASSES = 8
    NUM_GRAPHS = 2
    NUM_LAYERS = 3
    ALPHA = 0.2

    key, k_adj, k_x, k_w = jax.random.split(key, 4)

    # Dense, row-normalized adjacencies (spmm on dense adj == mm).
    adj_raw = jax.random.uniform(k_adj, (NUM_GRAPHS, N, N), jnp.float32)
    adj_stack = adj_raw / jnp.sum(adj_raw, axis=-1, keepdims=True)

    x = jax.random.normal(k_x, (N, INPUT_DIM), jnp.float32)

    model = LGEN(INPUT_DIM, HIDDEN, CLASSES, dropout=(0.5, 0.5),
                 num_graphs=NUM_GRAPHS, num_layers=NUM_LAYERS,
                 alpha=ALPHA, activation=True, use_bn=False, key=k_w)

    out = jax.block_until_ready(model(adj_stack, x))

    ref = model.reference(adj_stack, x)
    assert out.shape == (N, CLASSES)
    # bf16 MXU inputs / bf16 inter-layer activations -> loosened tolerance.
    assert jnp.allclose(out, ref, atol=2e-2, rtol=5e-2), "mismatch vs reference"

    print("KERNEL_OK")
</pallas_src>

<mosaic_0001>
module attributes {stable_mosaic.version = 11 : i64} {
  func.func @_lgen_layer_kernel(%arg0: i32, %arg1: i32, %arg2: i32, %arg3: memref<1x64x128xbf16, #tpu.memory_space<vmem>>, %arg4: memref<128x128xbf16, #tpu.memory_space<vmem>>, %arg5: memref<64x128xbf16, #tpu.memory_space<vmem>>, %arg6: memref<2x128x128xbf16, #tpu.memory_space<vmem>>, %arg7: memref<128x128xbf16, #tpu.memory_space<vmem>>, %arg8: memref<64x128xbf16, #tpu.memory_space<vmem>>, %arg9: memref<64x128xf32, #tpu.memory_space<vmem>>, %arg10: memref<64x128xf32, #tpu.memory_space<vmem>>) attributes {dimension_semantics = [#tpu.dimension_semantics<parallel>, #tpu.dimension_semantics<arbitrary>, #tpu.dimension_semantics<arbitrary>], iteration_bounds = array<i64: 2, 2, 1>, scalar_prefetch = 0 : i64, scratch_operands = 2 : i64, tpu.core_type = #tpu.core_type<tc>, window_params = [{transform_indices = @transform_0, window_bounds = array<i64: 1, 64, 128>}, {transform_indices = @transform_1, window_bounds = array<i64: 128, 128>}, {transform_indices = @transform_2, window_bounds = array<i64: 64, 128>}, {pipeline_mode = #tpu.pipeline_mode<synchronous>, transform_indices = @transform_3, window_bounds = array<i64: 2, 128, 128>}, {pipeline_mode = #tpu.pipeline_mode<synchronous>, transform_indices = @transform_4, window_bounds = array<i64: 128, 128>}, {transform_indices = @transform_5, window_bounds = array<i64: 64, 128>}]} {
    %c0_i32 = arith.constant 0 : i32
    %0 = arith.cmpi eq, %arg1, %c0_i32 : i32
    %c0_i32_0 = arith.constant 0 : i32
    %1 = arith.cmpi eq, %arg2, %c0_i32_0 : i32
    %2 = arith.andi %0, %1 : i1
    %3 = arith.extui %2 : i1 to i32
    %c0_i32_1 = arith.constant 0 : i32
    %4 = arith.cmpi ne, %3, %c0_i32_1 : i32
    scf.if %4 {
      %cst_16 = arith.constant 0.000000e+00 : f32
      %23 = vector.broadcast %cst_16 : f32 to vector<64x128xf32>
      %c0_17 = arith.constant 0 : index
      %c0_18 = arith.constant 0 : index
      %24 = vector.load %arg10[%c0_17, %c0_18] : memref<64x128xf32, #tpu.memory_space<vmem>>, vector<64x128xf32>
      tpu.vector_store %arg10[%c0_17, %c0_18], %23 {strides = array<i32>} : memref<64x128xf32, #tpu.memory_space<vmem>>, vector<64x128xf32>,
    } else {
    }
    %c0_i32_2 = arith.constant 0 : i32
    %5 = arith.cmpi eq, %arg2, %c0_i32_2 : i32
    %6 = arith.extui %5 : i1 to i32
    %c0_i32_3 = arith.constant 0 : i32
    %7 = arith.cmpi ne, %6, %c0_i32_3 : i32
    scf.if %7 {
      %cst_16 = arith.constant 0.000000e+00 : f32
      %23 = vector.broadcast %cst_16 : f32 to vector<64x128xf32>
      %c0_17 = arith.constant 0 : index
      %c0_18 = arith.constant 0 : index
      %24 = vector.load %arg9[%c0_17, %c0_18] : memref<64x128xf32, #tpu.memory_space<vmem>>, vector<64x128xf32>
      tpu.vector_store %arg9[%c0_17, %c0_18], %23 {strides = array<i32>} : memref<64x128xf32, #tpu.memory_space<vmem>>, vector<64x128xf32>,
    } else {
    }
    %c0 = arith.constant 0 : index
    %c0_4 = arith.constant 0 : index
    %8 = vector.load %arg9[%c0, %c0_4] : memref<64x128xf32, #tpu.memory_space<vmem>>, vector<64x128xf32>
    %c0_5 = arith.constant 0 : index
    %c0_6 = arith.constant 0 : index
    %c0_7 = arith.constant 0 : index
    %9 = vector.load %arg3[%c0_5, %c0_6, %c0_7] : memref<1x64x128xbf16, #tpu.memory_space<vmem>>, vector<1x64x128xbf16>
    %10 = vector.shape_cast %9 : vector<1x64x128xbf16> to vector<64x128xbf16>
    %c0_8 = arith.constant 0 : index
    %c0_9 = arith.constant 0 : index
    %11 = vector.load %arg4[%c0_8, %c0_9] : memref<128x128xbf16, #tpu.memory_space<vmem>>, vector<128x128xbf16>
    %cst = arith.constant dense<0.000000e+00> : vector<64x128xf32>
    %12 = tpu.matmul %10, %11, %cst {dimension_numbers = #tpu.dot_dimension_numbers<[1], [0], [0], [1], [0, 0, 1, 1], [], []>} : vector<64x128xbf16>, vector<128x128xbf16>, vector<64x128xf32> -> vector<64x128xf32>
    %13 = arith.addf %8, %12 : vector<64x128xf32>
    %c0_10 = arith.constant 0 : index
    %c0_11 = arith.constant 0 : index
    %14 = vector.load %arg9[%c0_10, %c0_11] : memref<64x128xf32, #tpu.memory_space<vmem>>, vector<64x128xf32>
    tpu.vector_store %arg9[%c0_10, %c0_11], %13 {strides = array<i32>} : memref<64x128xf32, #tpu.memory_space<vmem>>, vector<64x128xf32>,
    %c0_i32_12 = arith.constant 0 : i32
    %15 = arith.cmpi eq, %arg2, %c0_i32_12 : i32
    %16 = arith.extui %15 : i1 to i32
    %c0_i32_13 = arith.constant 0 : i32
    %17 = arith.cmpi ne, %16, %c0_i32_13 : i32
    scf.if %17 {
      %c0_16 = arith.constant 0 : index
      %c0_17 = arith.constant 0 : index
      %23 = vector.load %arg10[%c0_16, %c0_17] : memref<64x128xf32, #tpu.memory_space<vmem>>, vector<64x128xf32>
      %c0_18 = arith.constant 0 : index
      %c0_19 = arith.constant 0 : index
      %24 = vector.load %arg9[%c0_18, %c0_19] : memref<64x128xf32, #tpu.memory_space<vmem>>, vector<64x128xf32>
      %25 = arith.truncf %24 : vector<64x128xf32> to vector<64x128xbf16>
      %26 = arith.index_cast %arg1 : i32 to index
      %c0_20 = arith.constant 0 : index
      %c0_21 = arith.constant 0 : index
      %27 = vector.load %arg6[%26, %c0_20, %c0_21] : memref<2x128x128xbf16, #tpu.memory_space<vmem>>, vector<1x128x128xbf16>
      %28 = vector.shape_cast %27 : vector<1x128x128xbf16> to vector<128x128xbf16>
      %cst_22 = arith.constant dense<0.000000e+00> : vector<64x128xf32>
      %29 = tpu.matmul %25, %28, %cst_22 {dimension_numbers = #tpu.dot_dimension_numbers<[1], [0], [0], [1], [0, 0, 1, 1], [], []>} : vector<64x128xbf16>, vector<128x128xbf16>, vector<64x128xf32> -> vector<64x128xf32>
      %30 = arith.addf %23, %29 : vector<64x128xf32>
      %c0_23 = arith.constant 0 : index
      %c0_24 = arith.constant 0 : index
      %31 = vector.load %arg10[%c0_23, %c0_24] : memref<64x128xf32, #tpu.memory_space<vmem>>, vector<64x128xf32>
      tpu.vector_store %arg10[%c0_23, %c0_24], %30 {strides = array<i32>} : memref<64x128xf32, #tpu.memory_space<vmem>>, vector<64x128xf32>,
    } else {
    }
    %c1_i32 = arith.constant 1 : i32
    %18 = arith.cmpi eq, %arg1, %c1_i32 : i32
    %c0_i32_14 = arith.constant 0 : i32
    %19 = arith.cmpi eq, %arg2, %c0_i32_14 : i32
    %20 = arith.andi %18, %19 : i1
    %21 = arith.extui %20 : i1 to i32
    %c0_i32_15 = arith.constant 0 : i32
    %22 = arith.cmpi ne, %21, %c0_i32_15 : i32
    scf.if %22 {
      %c0_16 = arith.constant 0 : index
      %c0_17 = arith.constant 0 : index
      %23 = vector.load %arg5[%c0_16, %c0_17] : memref<64x128xbf16, #tpu.memory_space<vmem>>, vector<64x128xbf16>
      %c0_18 = arith.constant 0 : index
      %c0_19 = arith.constant 0 : index
      %24 = vector.load %arg7[%c0_18, %c0_19] : memref<128x128xbf16, #tpu.memory_space<vmem>>, vector<128x128xbf16>
      %cst_20 = arith.constant dense<0.000000e+00> : vector<64x128xf32>
      %25 = tpu.matmul %23, %24, %cst_20 {dimension_numbers = #tpu.dot_dimension_numbers<[1], [0], [0], [1], [0, 0, 1, 1], [], []>} : vector<64x128xbf16>, vector<128x128xbf16>, vector<64x128xf32> -> vector<64x128xf32>
      %c0_21 = arith.constant 0 : index
      %c0_22 = arith.constant 0 : index
      %26 = vector.load %arg10[%c0_21, %c0_22] : memref<64x128xf32, #tpu.memory_space<vmem>>, vector<64x128xf32>
      %cst_23 = arith.constant 4.000000e-01 : f32
      %27 = vector.broadcast %cst_23 : f32 to vector<64x128xf32>
      %28 = arith.mulf %27, %26 : vector<64x128xf32>
      %cst_24 = arith.constant 1.000000e-01 : f32
      %29 = vector.broadcast %cst_24 : f32 to vector<64x128xf32>
      %30 = arith.mulf %29, %25 : vector<64x128xf32>
      %31 = arith.addf %28, %30 : vector<64x128xf32>
      %cst_25 = arith.constant 0.000000e+00 : f32
      %32 = vector.broadcast %cst_25 : f32 to vector<64x128xf32>
      %33 = arith.maximumf %31, %32 : vector<64x128xf32>
      %34 = arith.truncf %33 : vector<64x128xf32> to vector<64x128xbf16>
      %c0_26 = arith.constant 0 : index
      %c0_27 = arith.constant 0 : index
      %35 = vector.load %arg8[%c0_26, %c0_27] : memref<64x128xbf16, #tpu.memory_space<vmem>>, vector<64x128xbf16>
      tpu.vector_store %arg8[%c0_26, %c0_27], %34 {strides = array<i32>} : memref<64x128xbf16, #tpu.memory_space<vmem>>, vector<64x128xbf16>,
    } else {
    }
    return
  }
  func.func @transform_0(%arg0: i32, %arg1: i32, %arg2: i32) -> (i32, i32, i32) {
    %c0_i32 = arith.constant 0 : i32
    return %arg1, %arg0, %arg2 : i32, i32, i32
  }
  func.func @transform_1(%arg0: i32, %arg1: i32, %arg2: i32) -> (i32, i32) {
    %c0_i32 = arith.constant 0 : i32
    %c0_i32_0 = arith.constant 0 : i32
    return %arg2, %c0_i32 : i32, i32
  }
  func.func @transform_2(%arg0: i32, %arg1: i32, %arg2: i32) -> (i32, i32) {
    %c0_i32 = arith.constant 0 : i32
    %c0_i32_0 = arith.constant 0 : i32
    return %arg0, %c0_i32 : i32, i32
  }
  func.func @transform_3(%arg0: i32, %arg1: i32, %arg2: i32) -> (i32, i32, i32) {
    %c0_i32 = arith.constant 0 : i32
    %c0_i32_0 = arith.constant 0 : i32
    %c0_i32_1 = arith.constant 0 : i32
    %c0_i32_2 = arith.constant 0 : i32
    return %c0_i32, %c0_i32_0, %c0_i32_1 : i32, i32, i32
  }
  func.func @transform_4(%arg0: i32, %arg1: i32, %arg2: i32) -> (i32, i32) {
    %c0_i32 = arith.constant 0 : i32
    %c0_i32_0 = arith.constant 0 : i32
    %c0_i32_1 = arith.constant 0 : i32
    return %c0_i32, %c0_i32_0 : i32, i32
  }
  func.func @transform_5(%arg0: i32, %arg1: i32, %arg2: i32) -> (i32, i32) {
    %c0_i32 = arith.constant 0 : i32
    %c0_i32_0 = arith.constant 0 : i32
    return %arg0, %c0_i32 : i32, i32
  }
}

</mosaic_0001>

<bundles_post_ra>
// kernel: tpu_custom_call.1
= control target key start
LH: loop header
LB: loop body
LE: loop exit
PB: predicated region body
PF: predicated region fallthrough
CT: control target
= control target key end

     0   :  { %s2313_s0 = inlined_call_operand.hbm [shape: bf16[2,128,128], index: 0, kind: input, shape index: {}]   ;;  %s2314_s1 = inlined_call_operand.hbm [shape: bf16[128,128], index: 1, kind: input, shape index: {}]   ;;  %s2315_s2 = inlined_call_operand.hbm [shape: bf16[128,128], index: 2, kind: input, shape index: {}]   ;;  %s2316_s3 = inlined_call_operand.hbm [shape: bf16[2,128,128], index: 3, kind: input, shape index: {}]   ;;  %s2317_s4 = inlined_call_operand.hbm [shape: bf16[128,128], index: 4, kind: input, shape index: {}]   ;;  %s2318_s5 = inlined_call_operand.hbm [shape: bf16[128,128], index: 5, kind: output, shape index: {}]  }
   0x1   :  { %2343 = sst [smem:[#allocation30_spill]] %s2314_s1 }
   0x2   :  { %2344 = sst [smem:[#allocation31_spill]] %s2318_s5 }
   0x3   :  { %10 = vsyncpa [#allocation5], 0 }
   0x4   :  { %12 = vsyncpa [#allocation5 + $0x1], 0 }
   0x5   :  { %13 = vsyncpa [#allocation8], 0 }
   0x6   :  { %14 = vsyncpa [#allocation12], 0 }
   0x7   :  { %15 = vsyncpa [#allocation6], 0 }
   0x8   :  { %17 = vsyncpa [#allocation6 + $0x1], 0  ;;  %s1878_s18 = smov 0   ;;  %s1880_s19 = smov 0  }
   0x9   :  { %s1882_s20 = smov 0   ;;  %s1884_s21 = smov 0  }
   0xa   :  { %s1886_s22 = smov 0   ;;  %s1888_s23 = smov 0  }
   0xb   :  { %s1890_s24 = smov 0   ;;  %s1892_s25 = smov 0  }
   0xc   :  { %s1894_s26 = smov 0   ;;  %s1896_s27 = smov 0  }
   0xd   :  { %s1898_s28 = smov 0  }
   0xe LB: > { %2345 = sst [smem:[#allocation20_spill]] %s1795_s18  ;;  %s1932_s29 = sadd.s32 4294967295, %s1835_s28   ;;  %s1835_s28 = sphi %s1898_s28, %s23_s28   ;;  %s1831_s27 = sphi %s1896_s27, %s2405_s27   ;;  %s1827_s26 = sphi %s1894_s26, %s2404_s26   ;;  %s1823_s25 = sphi %s1892_s25, %s2403_s25   ;;  %s1819_s24 = sphi %s1890_s24, %s2402_s24   ;;  %s1815_s23 = sphi %s1888_s23, %s2401_s23   ;;  %s1811_s22 = sphi %s1886_s22, %s2400_s22   ;;  %s1807_s21 = sphi %s1884_s21, %s2394_s21   ;;  %s1803_s20 = sphi %s1882_s20, %s2399_s20   ;;  %s1799_s19 = sphi %s1880_s19, %s2398_s19   ;;  %s1795_s18 = sphi %s1878_s18, %s2397_s18  }
   0xf   : > { %2346 = sst [smem:[#allocation21_spill]] %s1811_s22  ;;  %s1149_s30 = sadd.s32 4294967294, %s1835_s28  }
  0x10   : > { %2347 = sst [smem:[#allocation22_spill]] %s1819_s24  ;;  %p66_p0 = scmp.ne.s32.totalorder %s1811_s22, %s1807_s21 }
  0x11   : > { %2348 = sst [smem:[#allocation23_spill]] %s1823_s25  ;;  %p2319_p1 = scmp.eq.s32.totalorder %s1932_s29, 0 }
  0x12   : > { %p118_p2 = scmp.ne.s32.totalorder %s1799_s19, %s1795_s18  ;;  %p190_p5 = scmp.eq.s32.totalorder %s1149_s30, 3 }
  0x13   : > { %p1942_p4 = por %p2319_p1, %p66_p0  ;;  %p1150_p7 = scmp.ge.s32.totalorder %s1835_s28, 1 }
  0x14   : > { %p1948_p6 = por %p118_p2, %p2319_p1  ;;  %p1953_p8 = por %p190_p5, %p118_p2 }
  0x15   : > { %s2349_s6 = scalar_select %p1942_p4, 1, 0 }
  0x16   : > { %s2351_s7 = scalar_select %p1948_p6, 1, 0 }
  0x17   : > { %2350 = sst [smem:[#allocation24_spill]] %s2349_s6  ;;  %p197_p9 = scmp.lt.s32.totalorder %s1835_s28, 5 }
  0x18   : > { %2352 = sst [smem:[#allocation25_spill]] %s2351_s7  ;;  %s1837_s10 = smov [#allocation7]  }
  0x19   : > { %s2353_s8 = scalar_select %p1953_p8, 1, 0 }
  0x1a   : > { %p1958_p10 = pnand %p1150_p7, %p197_p9  ;;  %s212_s11 = sshll.u32 %s1837_s10, 4  ;;  %s213_s11 = int_to_ptr.vmem [resolvable:$true] %s212_s11 }
  0x1b   : > { %2354 = sst [smem:[#allocation26_spill]] %s2353_s8  ;;  %s2358_s1 = sld [smem:[#allocation30_spill]] }
  0x1c   : > { %s2355_s9 = scalar_select %p1958_p10, 1, 0 }
  0x1d   : > { %p1396_p11 = pneg %p1958_p10 }
  0x1e   : > { %2356 = sst [smem:[#allocation27_spill]] %s2355_s9 }
  0x1f   : > { %p1966_p12 = pnand %p1396_p11, %p2319_p1 }
  0x21   : > { %s2357_s12 = scalar_select %p1966_p12, 1, 0 }
  0x22   : > { %s1553_s15 = scalar_lea.hbm %s2358_s1, 1024  ;;  %p1978_p0 = pneg %p1966_p12 }
  0x23   : > { %p1554_p13 = scmp.ne.s32.totalorder %s2358_s1, %s1553_s15  ;;  %p1560_p7 = scmp.lt.u32.totalorder %s1553_s15, %s2358_s1 }
  0x25   : > { %p1556_p2 = pnand %p1978_p0, %p1554_p13 }
  0x27   : > { %p1557_p5 = pneg %p1556_p2 }
  0x29   : > { %p1562_p9 = pnand %p1560_p7, %p1557_p5 }
  0x2b   : > { %1565 = shalt.err (!%p1562_p9)
}
  0x2c   : > { %s1566_s13 = scalar_lea.vmem %s213_s11, 1024  ;;  %p1574_p8 = scmp.lt.s32.totalorder %s213_s11, %s213_s11 }
  0x2d   : > { %p1567_p11 = scmp.ne.s32.totalorder %s213_s11, %s1566_s13  ;;  %p1575_p6 = scmp.lt.s32.totalorder %s1566_s13, %s1566_s13 }
  0x2f   : > { %p1569_p1 = pnand %p1567_p11, %p1978_p0  ;;  %p1576_p4 = por %p1575_p6, %p1574_p8 }
  0x31   : > { %p1570_p3 = pneg %p1569_p1 }
  0x33   : > { %p1577_p10 = pnand %p1576_p4, %p1570_p3 }
  0x35   : > { %1580 = shalt.err (!%p1577_p10)
}
  0x36   : > { %s2324_s14 = smov 64   ;;  %s2326_s15 = smov 4  }
  0x37   : > { %1399 = dma.hbm_to_vmem [thread:$0]  (!%p1966_p12), %s2358_s1, 1024, %s213_s11, [#allocation8], %s2324_s14, %s2324_s14, %s2326_s15  }
  0x38   : > { %s38_s30 = sadd.s32 1, %s1827_s26  ;;  %s42_s10 = sadd.s32 1, %s1831_s27 }
  0x39   : > { %p40_p1 = scmp.ge.s32.totalorder %s38_s30, 2  ;;  %s53_s13 = sadd.s32 1, %s1815_s23 }
  0x3a   : > { %p60_p3 = scmp.ne.s32.totalorder %s1815_s23, %s1811_s22  ;;  %p2340_p4 = scmp.eq.s32.totalorder %s1835_s28, 0 }
  0x3b   : > { %s2407_s30 = smov (%p40_p1, %s38_s30), 0  ;;  %s2409_s10 = smov (!%p40_p1, %s42_s10), %s1831_s27 }
  0x3c   : > { %2360 = sst [smem:[#allocation28_spill]] %s2407_s30  ;;  %s46_s8 = ssub.s32 %s1827_s26, %s2407_s30 }
  0x3d   : > { %p44_p6 = scmp.ge.s32.totalorder %s2409_s10, 2  ;;  %p2339_p8 = scmp.lt.s32.totalorder %s1835_s28, 4 }
  0x3e   : > { %p2011_p10 = por %p2340_p4, %p60_p3  ;;  %s252_s16 = sand.u32 1, %s1835_s28  }
  0x3f   : > { %s2411_s10 = smov (%p44_p6, %s2409_s10), 0  ;;  %s254_s17 = sand.u32 1, %s1815_s23  }
  0x40   : > { %2362 = sst [smem:[#allocation29_spill]] %s2411_s10  ;;  %s2021_s14 = ssub.s32 %s1831_s27, %s2411_s10 }
  0x41   : > { %s1155_s15 = sshll.u32 %s254_s17, 5  ;;  %s48_s1 = sor.u32 %s2021_s14, %s46_s8 }
  0x42   : > { %p51_p2 = scmp.eq.s32.totalorder %s48_s1, 0  ;;  %s1156_s30 = sshll.u32 %s1831_s27, 3 }
  0x43   : > { %s1157_s18 = sshll.u32 %s1827_s26, 4  ;;  %s256_s24 = scalar_lea.vmem [#allocation4], %s1155_s15 }
  0x44   : > { %s2028_s5 = scalar_select %p51_p2, %s1815_s23, %s53_s13  }
  0x45   : > { %s263_s25 = sadd.s32 %s1157_s18, %s1156_s30  ;;  %s266_s7 = sshll.u32 %s256_s24, 4  ;;  %s2030_s7 = int_to_ptr.vmem [resolvable:$true] %s266_s7 }
  0x46   : > { %s1158_s6 = sshll.u32 %s263_s25, 6  ;;  %p2041_p5 = pnand %p2339_p8, %p2011_p10 }
  0x47   : > { %s2035_s10 = scalar_lea.hbm %s2313_s0, %s1158_s6  ;;  %s1840_s18 = smov [#allocation10]  }
  0x48   : > { %s2045_s24 = sshll.u32 %s1840_s18, 4  ;;  %s2047_s25 = scalar_lea.sflag [#allocation5], %s252_s16  ;;  %s226_s24 = int_to_ptr.vmem [resolvable:$true] %s2045_s24 }
  0x49   : > { %s1581_s22 = scalar_lea.hbm %s2035_s10, 512  ;;  %p1583_p9 = pneg %p2041_p5 }
  0x4a   : > { %p1582_p7 = scmp.ne.s32.totalorder %s2035_s10, %s1581_s22  ;;  %s1586_s9 = scalar_lea.hbm %s2313_s0, 2048 }
  0x4b   : > { %p1587_p3 = scmp.lt.u32.totalorder %s2035_s10, %s2313_s0  ;;  %p1588_p6 = scmp.lt.u32.totalorder %s1586_s9, %s1581_s22 }
  0x4c   : > { %p1584_p11 = pnand %p1583_p9, %p1582_p7  ;;  %p1590_p2 = scmp.lt.u32.totalorder %s1581_s22, %s2035_s10 }
  0x4d   : > { %p1589_p10 = por %p1588_p6, %p1587_p3 }
  0x4e   : > { %p1585_p1 = pneg %p1584_p11 }
  0x4f   : > { %p1591_p8 = por %p1590_p2, %p1589_p10 }
  0x51   : > { %p1592_p4 = pnand %p1591_p8, %p1585_p1 }
  0x53   : > { %1595 = shalt.err (!%p1592_p4)
}
  0x54   : > { %s1596_s13 = scalar_lea.vmem %s2030_s7, 512  ;;  %s1841_s11 = smov [#allocation4]  }
  0x55   : > { %p1597_p7 = scmp.ne.s32.totalorder %s2030_s7, %s1596_s13  ;;  %s1601_s16 = sshll.u32 %s1841_s11, 4  ;;  %s1602_s16 = int_to_ptr.vmem [resolvable:$false] %s1601_s16 }
  0x56   : > { %s1603_s17 = scalar_lea.vmem %s1602_s16, 1024  ;;  %p1604_p12 = scmp.lt.s32.totalorder %s2030_s7, %s1602_s16 }
  0x57   : > { %p1599_p11 = pnand %p1597_p7, %p1583_p9  ;;  %p1605_p3 = scmp.lt.s32.totalorder %s1603_s17, %s1596_s13 }
  0x59   : > { %p1600_p13 = pneg %p1599_p11  ;;  %p1606_p6 = por %p1605_p3, %p1604_p12 }
  0x5b   : > { %p1607_p10 = pnand %p1606_p6, %p1600_p13 }
  0x5d   : > { %1610 = shalt.err (!%p1607_p10)
}
  0x5e   : > { %s2364_s18 = smov 4   ;;  %s2365_s22 = smov 64  }
  0x5f   : > { %1409 = dma.hbm_to_vmem [thread:$0]  (!%p2041_p5), %s2035_s10, 512, %s2030_s7, %s2047_s25, %s2365_s22, %s2365_s22, %s2364_s18  }
  0x60   : > { %s1842_s6 = smov [#allocation11]   ;;  %s1611_s30 = scalar_lea.hbm %s2316_s3, 2048 }
  0x61   : > { %s238_s8 = sshll.u32 %s1842_s6, 4  ;;  %p1612_p12 = scmp.ne.s32.totalorder %s2316_s3, %s1611_s30  ;;  %s239_s8 = int_to_ptr.vmem [resolvable:$true] %s238_s8 }
  0x62   : > { %p1618_p13 = scmp.lt.u32.totalorder %s1611_s30, %s2316_s3 }
  0x63   : > { %p1614_p4 = pnand %p1612_p12, %p1978_p0 }
  0x65   : > { %p1615_p8 = pneg %p1614_p4 }
  0x67   : > { %p1620_p9 = pnand %p1618_p13, %p1615_p8 }
  0x69   : > { %1623 = shalt.err (!%p1620_p9)
}
  0x6a   : > { %s1624_s7 = scalar_lea.vmem %s226_s24, 2048  ;;  %p1632_p7 = scmp.lt.s32.totalorder %s226_s24, %s226_s24 }
  0x6b   : > { %p1625_p5 = scmp.ne.s32.totalorder %s226_s24, %s1624_s7  ;;  %p1633_p11 = scmp.lt.s32.totalorder %s1624_s7, %s1624_s7 }
  0x6d   : > { %p1627_p1 = pnand %p1625_p5, %p1978_p0  ;;  %p1634_p3 = por %p1633_p11, %p1632_p7 }
  0x6f   : > { %p1628_p2 = pneg %p1627_p1 }
  0x71   : > { %p1635_p6 = pnand %p1634_p3, %p1628_p2 }
  0x73   : > { %1638 = shalt.err (!%p1635_p6)
}
  0x74   : > { %p2366_p10 = scmp.ne.s32.totalorder %s2357_s12, 0  ;;  %s1639_s15 = scalar_lea.hbm %s2317_s4, 1024 }
  0x75   : > { %p1640_p12 = scmp.ne.s32.totalorder %s2317_s4, %s1639_s15  ;;  %p1646_p13 = scmp.lt.u32.totalorder %s1639_s15, %s2317_s4 }
  0x76   : > { %1402 = dma.hbm_to_vmem [thread:$0]  (!%p2366_p10), %s2316_s3, 2048, %s226_s24, [#allocation8], %s2365_s22, %s2365_s22, %s2364_s18  }
  0x77   : > { %p1642_p4 = pnand %p1640_p12, %p1978_p0 }
  0x79   : > { %p1643_p8 = pneg %p1642_p4 }
  0x7b   : > { %p1648_p9 = pnand %p1646_p13, %p1643_p8 }
  0x7d   : > { %1651 = shalt.err (!%p1648_p9)
}
  0x7e   : > { %s1652_s16 = scalar_lea.vmem %s239_s8, 1024  ;;  %p1660_p7 = scmp.lt.s32.totalorder %s239_s8, %s239_s8 }
  0x7f   : > { %p1653_p5 = scmp.ne.s32.totalorder %s239_s8, %s1652_s16  ;;  %p1661_p11 = scmp.lt.s32.totalorder %s1652_s16, %s1652_s16 }
  0x81   : > { %p1655_p1 = pnand %p1653_p5, %p1978_p0  ;;  %p1662_p3 = por %p1661_p11, %p1660_p7 }
  0x83   : > { %p1656_p2 = pneg %p1655_p1 }
  0x85   : > { %p1663_p6 = pnand %p1662_p3, %p1656_p2 }
  0x87   : > { %1666 = shalt.err (!%p1663_p6)
}
  0x88   : > { %1405 = dma.hbm_to_vmem [thread:$0]  (!%p2366_p10), %s2317_s4, 1024, %s239_s8, [#allocation12], %s2365_s22, %s2365_s22, %s2364_s18  }
  0x89   : > { %s1218_s21 = sshll.u32 %s1831_s27, 9  ;;  %s105_s10 = sadd.s32 1, %s1803_s20 }
  0x8a   : > { %p112_p0 = scmp.ne.s32.totalorder %s1803_s20, %s1799_s19  ;;  %p2367_p12 = scmp.eq.s32.totalorder %s2021_s14, 0 }
  0x8b   : > { %p2368_p4 = scmp.eq.s32.totalorder %s1835_s28, 0  ;;  %p2369_p13 = scmp.eq.s32.totalorder %s1932_s29, 3 }
  0x8c   : > { %s2128_s12 = scalar_select %p2367_p12, %s1803_s20, %s105_s10  }
  0x8d   : > { %p114_p8 = por %p112_p0, %p2368_p4  ;;  %p2134_p9 = por %p2369_p13, %p112_p0 }
  0x8e   : > { %s278_s6 = sand.u32 1, %s1803_s20   ;;  %p2371_p5 = scmp.lt.s32.totalorder %s1835_s28, 4 }
  0x8f   : > { %s1159_s9 = sshll.u32 %s278_s6, 5  ;;  %s2148_s14 = scalar_lea.hbm %s2315_s2, %s1218_s21 }
  0x90   : > { %p2141_p1 = pnand %p2371_p5, %p114_p8  ;;  %s280_s13 = scalar_lea.vmem [#allocation9], %s1159_s9 }
  0x91   : > { %s287_s11 = sshll.u32 %s280_s13, 4  ;;  %s1667_s1 = scalar_lea.hbm %s2148_s14, 512  ;;  %s2150_s11 = int_to_ptr.vmem [resolvable:$true] %s287_s11 }
  0x92   : > { %p1668_p10 = scmp.ne.s32.totalorder %s2148_s14, %s1667_s1  ;;  %p1669_p2 = pneg %p2141_p1 }
  0x93   : > { %s1672_s7 = scalar_lea.hbm %s2315_s2, 1024  ;;  %p1673_p3 = scmp.lt.u32.totalorder %s2148_s14, %s2315_s2 }
  0x94   : > { %p1670_p7 = pnand %p1669_p2, %p1668_p10  ;;  %p1674_p6 = scmp.lt.u32.totalorder %s1672_s7, %s1667_s1 }
  0x95   : > { %p1676_p12 = scmp.lt.u32.totalorder %s1667_s1, %s2148_s14 }
  0x96   : > { %p1671_p11 = pneg %p1670_p7  ;;  %p1675_p0 = por %p1674_p6, %p1673_p3 }
  0x98   : > { %p1677_p4 = por %p1676_p12, %p1675_p0 }
  0x9a   : > { %p1678_p8 = pnand %p1677_p4, %p1671_p11 }
  0x9c   : > { %1681 = shalt.err (!%p1678_p8)
}
  0x9d   : > { %s1682_s6 = scalar_lea.vmem %s2150_s11, 512  ;;  %s1843_s9 = smov [#allocation9]  }
  0x9e   : > { %p1683_p13 = scmp.ne.s32.totalorder %s2150_s11, %s1682_s6  ;;  %s1687_s8 = sshll.u32 %s1843_s9, 4  ;;  %s1688_s8 = int_to_ptr.vmem [resolvable:$false] %s1687_s8 }
  0x9f   : > { %s1689_s30 = scalar_lea.vmem %s1688_s8, 1024  ;;  %p1690_p7 = scmp.lt.s32.totalorder %s2150_s11, %s1688_s8 }
  0xa0   : > { %p1685_p5 = pnand %p1683_p13, %p1669_p2  ;;  %p1691_p3 = scmp.lt.s32.totalorder %s1689_s30, %s1682_s6 }
  0xa2   : > { %p1686_p10 = pneg %p1685_p5  ;;  %p1692_p6 = por %p1691_p3, %p1690_p7 }
  0xa4   : > { %p1693_p0 = pnand %p1692_p6, %p1686_p10 }
  0xa6   : > { %1696 = shalt.err (!%p1693_p0)
}
  0xa7   : > { %1412 = dma.hbm_to_vmem [thread:$0]  (!%p2141_p1), %s2148_s14, 512, %s2150_s11, %s2047_s25, %s2365_s22, %s2365_s22, %s2364_s18  }
  0xa8   : > { %s2373_s13 = sld [smem:[#allocation27_spill]] }
  0xae   : > { %p2374_p2 = scmp.ne.s32.totalorder %s2373_s13, 0 }
  0xaf   : > { %s2375_s1 = sld [smem:[#allocation21_spill]] (!%p2374_p2)  ;;  %s2376_s16 = sld [smem:[#allocation24_spill]] (!%p2374_p2) }
  0xb0   : > { %299 = sbr.rel (%p2374_p2) target bundleno = 933 (0x3a5), region = 40  ;;  %s301_s24 = sand.u32 (!%p2374_p2), 1, %s1932_s29  }
  0xb1   : > { %s302_s10 = scalar_lea.sflag (!%p2374_p2), [#allocation5], %s301_s24 }
  0xb5   : > { %s303_s7 = sand.u32 (!%p2374_p2), 1, %s2375_s1   ;;  %p2377_p11 = scmp.ne.s32.totalorder (!%p2374_p2), %s2376_s16, 0 }
  0xb6   : > { %s1163_s21 = sshll.u32 (!%p2374_p2), %s303_s7, 5 }
  0xb7   : > { %s2185_s6 = scalar_lea.vmem [#allocation4], %s1163_s21 }
  0xb8   : > { %1770 = dma.done.wait (%p2377_p11), %s302_s10, 512  }
  0xb9   : > { %1772 = vsyncadd (%p2377_p11), %s302_s10, 4294966784  ;;  %p2378_p12 = scmp.eq.s32.totalorder %s1932_s29, 0 }
  0xbb   : > { %1774 = dma.done.wait (%p2378_p12), [#allocation8], 1024   ;;  %p2379_p1 = pmov %p2378_p12 }
  0xbc   : > { %s2380_s25 = sld [smem:[#allocation25_spill]]  ;;  %s316_s18 = sand.u32 1, %s1799_s19  }
  0xbd   : > { %1776 = vsyncadd (%p2379_p1), [#allocation8], 4294966272  ;;  %s1165_s22 = sshll.u32 %s316_s18, 5 }
  0xbe   : > { %s2198_s15 = scalar_lea.vmem [#allocation9], %s1165_s22 }
  0xc2   : > { %p2381_p4 = scmp.ne.s32.totalorder %s2380_s25, 0 }
  0xc4   : > { %1778 = dma.done.wait (%p2381_p4), %s302_s10, 512  }
  0xc5   : > { %1780 = vsyncadd (%p2381_p4), %s302_s10, 4294966784  ;;  %p2382_p8 = pmov %p2379_p1 }
  0xc6   : > { %p2383_p13 = pmov %p2379_p1 }
  0xc7   : > { %1782 = dma.done.wait (%p2382_p8), [#allocation8], 2048  }
  0xc8   : > { %1784 = vsyncadd (%p2383_p13), [#allocation8], 4294965248  ;;  %p2384_p5 = pmov %p2379_p1 }
  0xc9   : > { %p2385_p10 = pmov %p2379_p1 }
  0xca   : > { %1786 = dma.done.wait (%p2384_p5), [#allocation12], 1024  }
  0xcb   : > { %1788 = vsyncadd (%p2385_p10), [#allocation12], 4294966272  ;;  %s2386_s14 = sld [smem:[#allocation22_spill]]  ;;  %s2213_s11 = scalar_lea.vmem [#allocation13], %s1165_s22 }
  0xd1   : > { %p363_p7 = scmp.eq.s32.totalorder %s2386_s14, 0 }
  0xd2   : > { %v1844_v0 = vmov (%p363_p7), 0.0  }
  0xd3   : > { %368 = sbr.rel (!%p363_p7) target bundleno = 218 (0xda), region = 64  ;;  %369 = vst [vmem:[#allocation3] sm:$0xff] (%p363_p7), %v1844_v0  ;;  %370 = vst [vmem:[#allocation3 + $0x8] sm:$0xff] (%p363_p7), %v1844_v0 }
  0xd4   : > { %371 = vst [vmem:[#allocation3 + $0x10] sm:$0xff] (%p363_p7), %v1844_v0  ;;  %372 = vst [vmem:[#allocation3 + $0x18] sm:$0xff] (%p363_p7), %v1844_v0 }
  0xd5   : > { %373 = vst [vmem:[#allocation3 + $0x20] sm:$0xff] (%p363_p7), %v1844_v0  ;;  %374 = vst [vmem:[#allocation3 + $0x28] sm:$0xff] (%p363_p7), %v1844_v0 }
  0xd6   : > { %375 = vst [vmem:[#allocation3 + $0x30] sm:$0xff] (%p363_p7), %v1844_v0  ;;  %376 = vst [vmem:[#allocation3 + $0x38] sm:$0xff] (%p363_p7), %v1844_v0 }
  0xda PF: > { %v1521_v1 = vld [vmem:[#allocation7] sm:$0xff]   ;;  %s2387_s9 = sld [smem:[#allocation22_spill]]  ;;  %v1522_v2 = vld [vmem:[#allocation7 + $0x8] sm:$0xff]   ;;  %v1523_v3 = vld [vmem:[#allocation7 + $0x10] sm:$0xff]  }
  0xdb   : > { %1290 = vmatprep.subr.bf16.mxu0 %v1521_v1  ;;  %v1524_v4 = vld [vmem:[#allocation7 + $0x18] sm:$0xff]   ;;  %v1529_v5 = vld [vmem:[%s2185_s6] sm:$0xff]   ;;  %v1526_v9 = vld [vmem:[#allocation7 + $0x28] sm:$0xff]  }
  0xdc   : > { %1291 = vmatpush3.bf16.msra.mxu0 %v1521_v1  ;;  %1306 = vmatprep.mubr.bf16.mxu0 %v1529_v5  ;;  %v1525_v6 = vld [vmem:[#allocation7 + $0x20] sm:$0xff]   ;;  %v1527_v11 = vld [vmem:[#allocation7 + $0x30] sm:$0xff]   ;;  %v1528_v13 = vld [vmem:[#allocation7 + $0x38] sm:$0xff]  }
  0xdd   : > { %1292 = vmatprep.subr.bf16.mxu0 %v1522_v2  ;;  %v1530_v16 = vld [vmem:[%s2185_s6 + $0x8] sm:$0xff]   ;;  %v1531_v17 = vld [vmem:[%s2185_s6 + $0x10] sm:$0xff]   ;;  %v1532_v19 = vld [vmem:[%s2185_s6 + $0x18] sm:$0xff]  }
  0xde   : > { %v578_v33 = vld [vmem:[#allocation3 + $0x10] sm:$0xff]  ;;  %v576_v34 = vld [vmem:[#allocation3] sm:$0xff]  ;;  %v579_v36 = vld [vmem:[#allocation3 + $0x18] sm:$0xff] }
  0xdf   : > { %v577_v39 = vld [vmem:[#allocation3 + $0x8] sm:$0xff]  ;;  %v582_v45 = vld [vmem:[#allocation3 + $0x30] sm:$0xff]  ;;  %v580_v46 = vld [vmem:[#allocation3 + $0x20] sm:$0xff] }
  0xe0   : > { %s1220_s29 = sshll.u32 %s2387_s9, 6  ;;  %1293 = vmatpush3.bf16.msra.mxu0 %v1522_v2  ;;  %p744_p3 = scmp.eq.s32.totalorder %s2387_s9, 1  ;;  %v583_v48 = vld [vmem:[#allocation3 + $0x38] sm:$0xff]  ;;  %v581_v51 = vld [vmem:[#allocation3 + $0x28] sm:$0xff] }
  0xe1   : > { %1294 = vmatprep.subr.bf16.mxu0 %v1523_v3  ;;  %s2217_s8 = scalar_lea.vmem [#allocation10], %s1220_s29  ;;  %v1541_v57 = vld [vmem:[#allocation11] sm:$0xff] (%p744_p3)   ;;  %v1542_v58 = vld [vmem:[#allocation11 + $0x8] sm:$0xff] (%p744_p3)   ;;  %v1543_v59 = vld [vmem:[#allocation11 + $0x10] sm:$0xff] (%p744_p3)  }
  0xe2   : > { %v1533_v7 = vld [vmem:[%s2217_s8] sm:$0xff]   ;;  %v1534_v8 = vld [vmem:[%s2217_s8 + $0x8] sm:$0xff]   ;;  %v1535_v10 = vld [vmem:[%s2217_s8 + $0x10] sm:$0xff]  }
  0xe3   : > { %1314 = vmatprep.subr.bf16.mxu1 %v1533_v7  ;;  %v1536_v12 = vld [vmem:[%s2217_s8 + $0x18] sm:$0xff]   ;;  %v1537_v14 = vld [vmem:[%s2217_s8 + $0x20] sm:$0xff]   ;;  %v1538_v15 = vld [vmem:[%s2217_s8 + $0x28] sm:$0xff]  }
  0xe4   : > { %1295 = vmatpush3.bf16.msra.mxu0 %v1523_v3  ;;  %1315 = vmatpush3.bf16.msra.mxu1 %v1533_v7  ;;  %v1539_v18 = vld [vmem:[%s2217_s8 + $0x30] sm:$0xff]   ;;  %v1540_v20 = vld [vmem:[%s2217_s8 + $0x38] sm:$0xff]   ;;  %v1549_v61 = vld [vmem:[%s2198_s15] sm:$0xff] (%p744_p3)  }
  0xe5   : > { %1296 = vmatprep.subr.bf16.mxu0 %v1524_v4  ;;  %1316 = vmatprep.subr.bf16.mxu1 %v1534_v8  ;;  %v1544_v60 = vld [vmem:[#allocation11 + $0x18] sm:$0xff] (%p744_p3)   ;;  %v1550_v62 = vld [vmem:[%s2198_s15 + $0x10] sm:$0xff] (%p744_p3)   ;;  %v1545_v63 = vld [vmem:[#allocation11 + $0x20] sm:$0xff] (%p744_p3)  }
  0xe6   : > { %v1546_v0 = vld [vmem:[#allocation11 + $0x28] sm:$0xff] (%p744_p3)   ;;  %v1547_v1 = vld [vmem:[#allocation11 + $0x30] sm:$0xff] (%p744_p3)   ;;  %v1548_v2 = vld [vmem:[#allocation11 + $0x38] sm:$0xff] (%p744_p3)  }
  0xe7   : > { %v1551_v3 = vld [vmem:[%s2198_s15 + $0x8] sm:$0xff] (%p744_p3)  }
  0xe8   : > { %1297 = vmatpush3.bf16.msra.mxu0 %v1524_v4  ;;  %1317 = vmatpush3.bf16.msra.mxu1 %v1534_v8  ;;  %v1552_v4 = vld [vmem:[%s2198_s15 + $0x18] sm:$0xff] (%p744_p3)  }
  0xe9   : > { %1298 = vmatprep.subr.bf16.mxu0 %v1525_v6  ;;  %1318 = vmatprep.subr.bf16.mxu1 %v1535_v10 }
  0xec   : > { %1299 = vmatpush3.bf16.msra.mxu0 %v1525_v6  ;;  %1319 = vmatpush3.bf16.msra.mxu1 %v1535_v10 }
  0xed   : > { %1300 = vmatprep.subr.bf16.mxu0 %v1526_v9  ;;  %1320 = vmatprep.subr.bf16.mxu1 %v1536_v12 }
  0xf0   : > { %1301 = vmatpush3.bf16.msra.mxu0 %v1526_v9  ;;  %1321 = vmatpush3.bf16.msra.mxu1 %v1536_v12 }
  0xf1   : > { %1302 = vmatprep.subr.bf16.mxu0 %v1527_v11  ;;  %1322 = vmatprep.subr.bf16.mxu1 %v1537_v14 }
  0xf4   : > { %1303 = vmatpush3.bf16.msra.mxu0 %v1527_v11  ;;  %1323 = vmatpush3.bf16.msra.mxu1 %v1537_v14 }
  0xf5   : > { %1304 = vmatprep.subr.bf16.mxu0 %v1528_v13  ;;  %1324 = vmatprep.subr.bf16.mxu1 %v1538_v15 }
  0xf8   : > { %1305 = vmatpush3.bf16.msra.mxu0 %v1528_v13  ;;  %1325 = vmatpush3.bf16.msra.mxu1 %v1538_v15 }
  0xf9   : > { %1326 = vmatprep.subr.bf16.mxu1 %v1539_v18  ;;  %1338 = vmatprep.subr.bf16.mxu0 (%p744_p3), %v1541_v57 }
  0xfb   : > { %1307 = vmatmul.mubr.bf16.vlgmr.msra.gmra.mrb[0].mxu0 %v1530_v16 }
  0xfc   : > { %1310 = vmatprep.mubr.bf16.mxu0 %v1531_v17  ;;  %1327 = vmatpush3.bf16.msra.mxu1 %v1539_v18 }
  0xfd   : > { %1328 = vmatprep.subr.bf16.mxu1 %v1540_v20  ;;  %1339 = vmatpush3.bf16.msra.mxu0 (%p744_p3), %v1541_v57 }
  0xfe   : > { %1340 = vmatprep.subr.bf16.mxu0 (%p744_p3), %v1542_v58 }
 0x100   : > { %1329 = vmatpush3.bf16.msra.mxu1 %v1540_v20 }
 0x101   : > { %1362 = vmatprep.subr.bf16.mxu1 (%p744_p3), %v1541_v57  ;;  %1341 = vmatpush3.bf16.msra.mxu0 (%p744_p3), %v1542_v58 }
 0x102   : > { %1342 = vmatprep.subr.bf16.mxu0 (%p744_p3), %v1543_v59 }
 0x103   : > { %1311 = vmatmul.mubr.bf16.gmra.mrb[4].mxu0 %v1532_v19 }
 0x104   : > { %1354 = vmatprep.mubr.bf16.mxu0 (%p744_p3), %v1549_v61 }
 0x105   : > { %1343 = vmatpush3.bf16.msra.mxu0 (%p744_p3), %v1543_v59 }
 0x106   : > { %1344 = vmatprep.subr.bf16.mxu0 (%p744_p3), %v1544_v60 }
 0x109   : > { %1345 = vmatpush3.bf16.msra.mxu0 (%p744_p3), %v1544_v60 }
 0x10a   : > { %1346 = vmatprep.subr.bf16.mxu0 (%p744_p3), %v1545_v63 }
 0x10d   : > { %1347 = vmatpush3.bf16.msra.mxu0 (%p744_p3), %v1545_v63 }
 0x10e   : > { %1348 = vmatprep.subr.bf16.mxu0 (%p744_p3), %v1546_v0 }
 0x111   : > { %1349 = vmatpush3.bf16.msra.mxu0 (%p744_p3), %v1546_v0 }
 0x112   : > { %1350 = vmatprep.subr.bf16.mxu0 (%p744_p3), %v1547_v1 }
 0x115   : > { %1351 = vmatpush3.bf16.msra.mxu0 (%p744_p3), %v1547_v1 }
 0x116   : > { %1352 = vmatprep.subr.bf16.mxu0 (%p744_p3), %v1548_v2 }
 0x119   : > { %1353 = vmatpush3.bf16.msra.mxu0 (%p744_p3), %v1548_v2 }
 0x1ce   : > { %v1308_v21 = vpop.f32.mrb[0].mxu0 }
 0x1cf   : > { %v526_v22 = vpop.f32.mrb[1].mxu0 }
 0x1d0   : > { %v1309_v23 = vpop.f32.mrb[2].mxu0 }
 0x1d1   : > { %v593_v24 = vpack.c.bf16 %v1309_v23, %v1308_v21  ;;  %v529_v25 = vpop.f32.mrb[3].mxu0  ;;  %1355 = vmatmul.mubr.bf16.vlgmr.msra.gmra.mrb[0].mxu0 (%p744_p3), %v1551_v3 }
 0x1d2   : > { %v592_v26 = vpack.c.bf16 %v529_v25, %v526_v22 }
 0x1d4   : > { %1330 = vmatprep.mubr.bf16.mxu1 %v592_v26 }
 0x1d5   : > { %1331 = vmatmul.mubr.bf16.vlgmr.msra.gmra.mrb[0].mxu1 %v593_v24 }
 0x1d6   : > { %v1312_v27 = vpop.f32.mrb[4].mxu0  ;;  %1370 = vmatpush3.bf16.msra.mxu1 (%p744_p3), %v1541_v57 }
 0x1d7   : > { %v542_v28 = vpop.f32.mrb[5].mxu0  ;;  %1363 = vmatprep.subr.bf16.mxu1 (%p744_p3), %v1542_v58 }
 0x1d8   : > { %v1313_v29 = vpop.f32.mrb[6].mxu0 }
 0x1d9   : > { %v595_v30 = vpack.c.bf16 %v1313_v29, %v1312_v27  ;;  %v545_v31 = vpop.f32.mrb[7].mxu0 }
 0x1da   : > { %v594_v32 = vpack.c.bf16 %v545_v31, %v542_v28  ;;  %1371 = vmatpush3.bf16.msra.mxu1 (%p744_p3), %v1542_v58 }
 0x1db   : > { %1364 = vmatprep.subr.bf16.mxu1 (%p744_p3), %v1543_v59 }
 0x1dc   : > { %1334 = vmatprep.mubr.bf16.mxu1 %v594_v32 }
 0x1dd   : > { %1335 = vmatmul.mubr.bf16.gmra.mrb[4].mxu1 %v595_v30 }
 0x1de   : > { %1372 = vmatpush3.bf16.msra.mxu1 (%p744_p3), %v1543_v59  ;;  %1358 = vmatprep.mubr.bf16.mxu1 (%p744_p3), %v1550_v62 }
 0x1df   : > { %1365 = vmatprep.subr.bf16.mxu1 (%p744_p3), %v1544_v60 }
 0x1e2   : > { %1373 = vmatpush3.bf16.msra.mxu1 (%p744_p3), %v1544_v60 }
 0x1e3   : > { %1366 = vmatprep.subr.bf16.mxu1 (%p744_p3), %v1545_v63 }
 0x1e6   : > { %1374 = vmatpush3.bf16.msra.mxu1 (%p744_p3), %v1545_v63 }
 0x1e7   : > { %1367 = vmatprep.subr.bf16.mxu1 (%p744_p3), %v1546_v0 }
 0x1ea   : > { %1375 = vmatpush3.bf16.msra.mxu1 (%p744_p3), %v1546_v0 }
 0x1eb   : > { %1368 = vmatprep.subr.bf16.mxu1 (%p744_p3), %v1547_v1 }
 0x1ee   : > { %1376 = vmatpush3.bf16.msra.mxu1 (%p744_p3), %v1547_v1 }
 0x1ef   : > { %1369 = vmatprep.subr.bf16.mxu1 (%p744_p3), %v1548_v2 }
 0x1f2   : > { %1377 = vmatpush3.bf16.msra.mxu1 (%p744_p3), %v1548_v2 }
 0x2a4   : > { %v1356_v19 = vpop.f32.mrb[0].mxu0 (%p744_p3) }
 0x2a5   : > { %v928_v23 = vmul.f32 (%p744_p3), 0.1, %v1356_v19  ;;  %v879_v25 = vpop.f32.mrb[1].mxu0 (%p744_p3) }
 0x2a6   : > { %v926_v27 = vmul.f32 (%p744_p3), 0.1, %v879_v25  ;;  %v1357_v29 = vpop.f32.mrb[2].mxu0 (%p744_p3) }
 0x2a8   : > { %v1332_v35 = vpop.f32.mrb[0].mxu1 }
 0x2a9   : > { %v730_v37 = vadd.f32 %v1332_v35, %v578_v33  ;;  %v697_v38 = vpop.f32.mrb[1].mxu1  ;;  %v929_v33 = vmul.f32 (%p744_p3), 0.1, %v1357_v29  ;;  %v882_v35 = vpop.f32.mrb[3].mxu0 (%p744_p3) }
 0x2aa   : > { %v728_v40 = vadd.f32 %v697_v38, %v576_v34  ;;  %v1333_v41 = vpop.f32.mrb[2].mxu1 }
 0x2ab   : > { %738 = vst [vmem:[#allocation3 + $0x10] sm:$0xff] %v730_v37  ;;  %v731_v42 = vadd.f32 %v1333_v41, %v579_v36  ;;  %v700_v43 = vpop.f32.mrb[3].mxu1  ;;  %1359 = vmatmul.mubr.bf16.vlgmr.msra.gmra.mrb[0].mxu1 (%p744_p3), %v1552_v4 }
 0x2ac   : > { %736 = vst [vmem:[#allocation3] sm:$0xff] %v728_v40  ;;  %v729_v44 = vadd.f32 %v700_v43, %v577_v39  ;;  %v927_v39 = vmul.f32 (%p744_p3), 0.1, %v882_v35 }
 0x2ad   : > { %739 = vst [vmem:[#allocation3 + $0x18] sm:$0xff] %v731_v42 }
 0x2ae   : > { %737 = vst [vmem:[#allocation3 + $0x8] sm:$0xff] %v729_v44 }
 0x2b0   : > { %v1336_v47 = vpop.f32.mrb[4].mxu1  ;;  %748 = sbr.rel (!%p744_p3) target bundleno = 907 (0x38b), region = 76 }
 0x2b1   : > { %v734_v49 = vadd.f32 %v1336_v47, %v582_v45  ;;  %v713_v50 = vpop.f32.mrb[5].mxu1 }
 0x2b2   : > { %v732_v52 = vadd.f32 %v713_v50, %v580_v46  ;;  %v1337_v53 = vpop.f32.mrb[6].mxu1  ;;  %v912_v5 = vld [vmem:[#allocation3 + $0x10] sm:$0xff] (%p744_p3) }
 0x2b3   : > { %742 = vst [vmem:[#allocation3 + $0x30] sm:$0xff] %v734_v49  ;;  %v735_v54 = vadd.f32 %v1337_v53, %v583_v48  ;;  %v716_v55 = vpop.f32.mrb[7].mxu1  ;;  %v910_v7 = vld [vmem:[#allocation3] sm:$0xff] (%p744_p3)  ;;  %v920_v13 = vmul.f32 (%p744_p3), 0.4, %v912_v5 }
 0x2b4   : > { %740 = vst [vmem:[#allocation3 + $0x20] sm:$0xff] %v732_v52  ;;  %v733_v56 = vadd.f32 %v716_v55, %v581_v51  ;;  %v913_v9 = vld [vmem:[#allocation3 + $0x18] sm:$0xff] (%p744_p3)  ;;  %v918_v15 = vmul.f32 (%p744_p3), 0.4, %v910_v7 }
 0x2b5   : > { %743 = vst [vmem:[#allocation3 + $0x38] sm:$0xff] %v735_v54  ;;  %v911_v11 = vld [vmem:[#allocation3 + $0x8] sm:$0xff] (%p744_p3)  ;;  %v921_v17 = vmul.f32 (%p744_p3), 0.4, %v913_v9  ;;  %v936_v31 = vadd.f32 (%p744_p3), %v928_v23, %v920_v13 }
 0x2b6   : > { %741 = vst [vmem:[#allocation3 + $0x28] sm:$0xff] %v733_v56  ;;  %v919_v21 = vmul.f32 (%p744_p3), 0.4, %v911_v11  ;;  %v934_v37 = vadd.f32 (%p744_p3), %v926_v27, %v918_v15 }
 0x2b7   : > { %v937_v41 = vadd.f32 %v929_v33, %v921_v17  ;;  %v944_v45 = vmax.f32 %v936_v31, 0.0 }
 0x2b8   : > { %v935_v43 = vadd.f32 %v927_v39, %v919_v21  ;;  %v942_v49 = vmax.f32 %v934_v37, 0.0 }
 0x2b9   : > { %v945_v47 = vmax.f32 %v937_v41, 0.0 }
 0x2ba   : > { %v916_v6 = vld [vmem:[#allocation3 + $0x30] sm:$0xff]  ;;  %v943_v51 = vmax.f32 %v935_v43, 0.0 }
 0x2bb   : > { %v914_v8 = vld [vmem:[#allocation3 + $0x20] sm:$0xff]  ;;  %v924_v14 = vmul.f32 0.4, %v916_v6  ;;  %v1239_v53 = vpack.c.bf16 %v945_v47, %v944_v45 }
 0x2bc   : > { %v917_v10 = vld [vmem:[#allocation3 + $0x38] sm:$0xff]  ;;  %v922_v16 = vmul.f32 0.4, %v914_v8  ;;  %v1234_v55 = vpack.c.bf16 %v943_v51, %v942_v49 }
 0x2bd   : > { %v915_v12 = vld [vmem:[#allocation3 + $0x28] sm:$0xff]  ;;  %v925_v18 = vmul.f32 0.4, %v917_v10  ;;  %1251 = vst [vmem:[%s2213_s11 + $0x8] sm:$0xff] %v1239_v53  }
 0x2be   : > { %v923_v22 = vmul.f32 0.4, %v915_v12  ;;  %1235 = vst [vmem:[%s2213_s11] sm:$0xff] %v1234_v55  }
 0x37e   : > { %v1360_v20 = vpop.f32.mrb[0].mxu1 }
 0x37f   : > { %v932_v24 = vmul.f32 0.1, %v1360_v20  ;;  %v895_v26 = vpop.f32.mrb[1].mxu1 }
 0x380   : > { %v930_v28 = vmul.f32 0.1, %v895_v26  ;;  %v1361_v30 = vpop.f32.mrb[2].mxu1 }
 0x381   : > { %v940_v32 = vadd.f32 %v932_v24, %v924_v14  ;;  %v933_v34 = vmul.f32 0.1, %v1361_v30  ;;  %v898_v36 = vpop.f32.mrb[3].mxu1 }
 0x382   : > { %v938_v38 = vadd.f32 %v930_v28, %v922_v16  ;;  %v931_v40 = vmul.f32 0.1, %v898_v36 }
 0x383   : > { %v941_v42 = vadd.f32 %v933_v34, %v925_v18  ;;  %v948_v46 = vmax.f32 %v940_v32, 0.0 }
 0x384   : > { %v939_v44 = vadd.f32 %v931_v40, %v923_v22  ;;  %v946_v50 = vmax.f32 %v938_v38, 0.0 }
 0x385   : > { %v949_v48 = vmax.f32 %v941_v42, 0.0 }
 0x386   : > { %v947_v52 = vmax.f32 %v939_v44, 0.0 }
 0x387   : > { %v1249_v54 = vpack.c.bf16 %v949_v48, %v948_v46 }
 0x388   : > { %v1244_v56 = vpack.c.bf16 %v947_v52, %v946_v50 }
 0x389   : > { %1253 = vst [vmem:[%s2213_s11 + $0x18] sm:$0xff] %v1249_v54  }
 0x38a   : > { %1252 = vst [vmem:[%s2213_s11 + $0x10] sm:$0xff] %v1244_v56  }
 0x38b PF: > { %s2388_s30 = sld [smem:[#allocation23_spill]]  ;;  %s2389_s24 = sld [smem:[#allocation31_spill]] }
 0x38c   : > { %s1004_s10 = sshll.u32 %s2213_s11, 4  ;;  %s2252_s6 = scalar_lea.sflag [#allocation6], %s316_s18  ;;  %s2248_s10 = int_to_ptr.vmem [resolvable:$true] %s1004_s10 }
 0x38d   : > { %s1697_s25 = scalar_lea.vmem %s2248_s10, 512  ;;  %s1845_s22 = smov [#allocation13]  }
 0x38e   : > { %p1698_p6 = scmp.ne.s32.totalorder %s2248_s10, %s1697_s25  ;;  %s1701_s15 = sshll.u32 %s1845_s22, 4  ;;  %s1702_s15 = int_to_ptr.vmem [resolvable:$false] %s1701_s15 }
 0x38f   : > { %s1703_s14 = scalar_lea.vmem %s1702_s15, 1024  ;;  %p1704_p11 = scmp.lt.s32.totalorder %s2248_s10, %s1702_s15 }
 0x390   : > { %p1699_p0 = pnand %p1698_p6, %p2134_p9  ;;  %p1705_p12 = scmp.lt.s32.totalorder %s1703_s14, %s1697_s25 }
 0x391   : > { %s1230_s13 = sshll.u32 %s2388_s30, 9  ;;  %s2390_s7 = smov %s2389_s24 }
 0x392   : > { %s2245_s21 = scalar_lea.hbm %s2389_s24, %s1230_s13  ;;  %p1700_p2 = pneg %p1699_p0 }
 0x393   : > { %p1706_p1 = por %p1705_p12, %p1704_p11 }
 0x395   : > { %p1707_p4 = pnand %p1706_p1, %p1700_p2 }
 0x397   : > { %1710 = shalt.err (!%p1707_p4)
}
 0x398   : > { %s1711_s18 = scalar_lea.hbm %s2245_s21, 512  ;;  %s1715_s29 = scalar_lea.hbm %s2390_s7, 1024 }
 0x399   : > { %p1712_p8 = scmp.ne.s32.totalorder %s2245_s21, %s1711_s18  ;;  %p1716_p10 = scmp.lt.u32.totalorder %s2245_s21, %s2390_s7 }
 0x39a   : > { %p1717_p7 = scmp.lt.u32.totalorder %s1715_s29, %s1711_s18  ;;  %p1719_p6 = scmp.lt.u32.totalorder %s1711_s18, %s2245_s21 }
 0x39b   : > { %p1713_p13 = pnand %p1712_p8, %p2134_p9 }
 0x39c   : > { %p1718_p3 = por %p1717_p7, %p1716_p10 }
 0x39d   : > { %p1714_p5 = pneg %p1713_p13 }
 0x39e   : > { %p1720_p0 = por %p1719_p6, %p1718_p3 }
 0x3a0   : > { %p1721_p2 = pnand %p1720_p0, %p1714_p5 }
 0x3a2   : > { %1724 = shalt.err (!%p1721_p2)
}
 0x3a3   : > { %s1846_s13 = smov 64   ;;  %s1847_s1 = smov 4  }
 0x3a4   : > { %1394 = dma.vmem_to_hbm [thread:$0]  (%p2134_p9), %s2248_s10, 512, %s2245_s21, %s2252_s6, %s1846_s13, %s1846_s13, %s1847_s1  }
 0x3a5 PF: > { %s2391_s16 = sld [smem:[#allocation20_spill]]  ;;  %s2392_s24 = sld [smem:[#allocation26_spill]] }
 0x3a6   : > { %p1424_p11 = scmp.ge.s32.totalorder %s1835_s28, 2 }
 0x3ab   : > { %s1019_s25 = sand.u32 1, %s2391_s16   ;;  %p2393_p12 = scmp.ne.s32.totalorder %s2392_s24, 0 }
 0x3ac   : > { %s1020_s22 = scalar_lea.sflag [#allocation6], %s1019_s25 }
 0x3ad   : > { %p1414_p1 = pnand %p1424_p11, %p2393_p12 }
 0x3af   : > { %1790 = dma.done.wait (!%p1414_p1), %s1020_s22, 512  }
 0x3b0   : > { %1792 = vsyncadd (!%p1414_p1), %s1020_s22, 4294966784  ;;  %s23_s28 = sadd.s32 1, %s1835_s28   ;;  %s2394_s21 = sld [smem:[#allocation21_spill]] }
 0x3b1   : > { %p20_p4 = scmp.ge.s32.totalorder %s23_s28, 6   ;;  %s2395_s17 = sld [smem:[#allocation28_spill]] }
 0x3b2   : > { %s2396_s10 = sld [smem:[#allocation29_spill]]  ;;  %s2397_s18 = smov %s1799_s19 }
 0x3b3   : > { %s2398_s19 = smov %s1803_s20  ;;  %s2399_s20 = smov %s2128_s12 }
 0x3b4   : > { %s2400_s22 = smov %s1815_s23  ;;  %s2401_s23 = smov %s2028_s5 }
 0x3b5   : > { %s2402_s24 = smov %s1827_s26  ;;  %s2403_s25 = smov %s1831_s27 }
 0x3b6   :  { %22 = sbr.rel (!%p20_p4) target bundleno = 14 (0xe), region = 126 }
 0x3b7   : > { %s2404_s26 = smov %s2395_s17 }
 0x3b8   : > { %s2405_s27 = smov %s2396_s10 }
 0x3bd   :  { %1025 = vsyncpa [#allocation5], 1 }
 0x3be   :  { %1027 = vsyncpa [#allocation5 + $0x1], 1 }
 0x3bf   :  { %1028 = vsyncpa [#allocation8], 1 }
 0x3c0   :  { %1029 = vsyncpa [#allocation12], 1 }
 0x3c1   :  { %1030 = vsyncpa [#allocation6], 1 }
 0x3c2   :  { %1032 = vsyncpa [#allocation6 + $0x1], 1 }

</bundles_post_ra>
